<compile_context>
chip_gen: v6e
topology: v6e:2x2x1
jax: 0.10.0
libtpu: 0.0.40
codegen_flags: <defaults>
</compile_context>

<pallas_src>
import jax
import jax.numpy as jnp
from jax.experimental import pallas as pl
from jax.experimental.pallas import tpu as pltpu


# ----------------------------------------------------------------------------
# Kernels
# ----------------------------------------------------------------------------
def _copy_rows_kernel(q_ref, o_ref):
    # Lane-dense (rows, 128) tile copy: full unmasked 128-lane stores.
    o_ref[...] = q_ref[...]


def _expand_copy_kernel(q_ref, o_ref):
    # Fallback: (Q, C) -> (1, Q, C) in one full-array block.
    o_ref[...] = q_ref[...][None, :, :]


# ----------------------------------------------------------------------------
# Forward implementation
# ----------------------------------------------------------------------------
def _pick_row_tile(rows: int, max_rows: int = 2048) -> int:
    """Largest tile <= max_rows that divides `rows` (power-of-two halving)."""
    if rows <= max_rows:
        return rows
    t = max_rows
    while t > 1 and rows % t != 0:
        t //= 2
    return max(t, 1)


def _forward_impl(query: jax.Array) -> jax.Array:
    q, c = query.shape
    n = q * c
    itemsize = jnp.dtype(query.dtype).itemsize
    cost = pl.CostEstimate(flops=0, transcendentals=0,
                           bytes_accessed=2 * n * itemsize)

    if n % 128 == 0:
        # Lane-dense path: present the parameter as a (rows, 128) slab.
        rows = n // 128
        tile = _pick_row_tile(rows)
        flat = query.reshape(rows, 128)  # metadata-only reshape
        out = pl.pallas_call(
            _copy_rows_kernel,
            out_shape=jax.ShapeDtypeStruct((rows, 128), query.dtype),
            grid=(rows // tile,),
            in_specs=[pl.BlockSpec((tile, 128), lambda i: (i, 0))],
            out_specs=pl.BlockSpec((tile, 128), lambda i: (i, 0)),
            compiler_params=pltpu.CompilerParams(
                dimension_semantics=("parallel",)),
            cost_estimate=cost,
        )(flat)
        return out.reshape(1, q, c)  # metadata-only reshape

    # Fallback: full-array block (legal since block dims == array dims),
    # batch dim emitted inside the call.
    return pl.pallas_call(
        _expand_copy_kernel,
        out_shape=jax.ShapeDtypeStruct((1, q, c), query.dtype),
        in_specs=[pl.BlockSpec((q, c), lambda: (0, 0))],
        out_specs=pl.BlockSpec((1, q, c), lambda: (0, 0, 0)),
        cost_estimate=cost,
    )(query)


# Differentiable wrapper: the module's whole point is a *trainable* query.
@jax.custom_vjp
def trainable_query_provider_forward(query: jax.Array) -> jax.Array:
    """Pallas implementation of TrainableQueryProvider.forward.

    Args:
      query: (num_queries, num_query_channels) learnable parameter.
    Returns:
      (1, num_queries, num_query_channels) array, same dtype as `query`.
    """
    return _forward_impl(query)


def _fwd(query):
    return _forward_impl(query), None


def _bwd(_, g):
    # d/dquery of query[None, ...] is just the cotangent with batch squeezed.
    return (jnp.squeeze(g, axis=0),)


trainable_query_provider_forward.defvjp(_fwd, _bwd)


# ----------------------------------------------------------------------------
# Module-style wrapper
# ----------------------------------------------------------------------------
class TrainableQueryProviderPallas:
    """JAX/Pallas port of the PyTorch TrainableQueryProvider module."""

    def __init__(self, num_queries: int, num_query_channels: int,
                 init_scale: float = 0.02, *, key: jax.Array):
        # Matches torch's normal_(0.0, init_scale) in distribution.
        self._query = (
            jax.random.normal(key, (num_queries, num_query_channels),
                              dtype=jnp.float32) * init_scale
        )

    @property
    def num_query_channels(self) -> int:
        return self._query.shape[-1]

    def __call__(self, x=None):
        # x is ignored, exactly as in the PyTorch forward.
        return trainable_query_provider_forward(self._query)


# ----------------------------------------------------------------------------
# Smoke test
# ----------------------------------------------------------------------------
if __name__ == "__main__":
    num_queries = 8
    num_query_channels = 32

    key = jax.random.PRNGKey(0)
    provider = TrainableQueryProviderPallas(
        num_queries, num_query_channels, init_scale=0.02, key=key
    )

    # Eager forward.
    out = jax.block_until_ready(provider())  # forward(x=None)
    ref = provider._query[None, ...]
    assert out.shape == (1, num_queries, num_query_channels), out.shape
    assert out.dtype == ref.dtype
    assert bool(jnp.array_equal(out, ref))

    # Jitted path (how it would run inside a model).
    jit_out = jax.block_until_ready(
        jax.jit(trainable_query_provider_forward)(provider._query)
    )
    assert bool(jnp.array_equal(jit_out, ref))

    # Gradient path: query must be trainable through this op.
    grads = jax.block_until_ready(
        jax.grad(lambda p: jnp.sum(trainable_query_provider_forward(p)))(
            provider._query)
    )
    assert grads.shape == provider._query.shape
    assert bool(jnp.array_equal(grads, jnp.ones_like(provider._query)))

    # Fallback (non-128-divisible) path for completeness.
    odd_q = jax.random.normal(jax.random.PRNGKey(1), (5, 24), jnp.float32)
    odd_out = jax.block_until_ready(trainable_query_provider_forward(odd_q))
    assert bool(jnp.array_equal(odd_out, odd_q[None, ...]))

    print("KERNEL_OK")
</pallas_src>

<mosaic_0001>
module attributes {stable_mosaic.version = 11 : i64} {
  func.func @_copy_rows_kernel(%arg0: i32, %arg1: memref<2x128xf32, #tpu.memory_space<vmem>>, %arg2: memref<2x128xf32, #tpu.memory_space<vmem>>) attributes {dimension_semantics = [#tpu.dimension_semantics<parallel>], iteration_bounds = array<i64: 1>, scalar_prefetch = 0 : i64, scratch_operands = 0 : i64, tpu.core_type = #tpu.core_type<tc>, window_params = [{transform_indices = @transform_0, window_bounds = array<i64: 2, 128>}, {transform_indices = @transform_1, window_bounds = array<i64: 2, 128>}]} {
    %c0 = arith.constant 0 : index
    %c0_0 = arith.constant 0 : index
    %0 = vector.load %arg1[%c0, %c0_0] : memref<2x128xf32, #tpu.memory_space<vmem>>, vector<2x128xf32>
    %c0_1 = arith.constant 0 : index
    %c0_2 = arith.constant 0 : index
    %1 = vector.load %arg2[%c0_1, %c0_2] : memref<2x128xf32, #tpu.memory_space<vmem>>, vector<2x128xf32>
    tpu.vector_store %arg2[%c0_1, %c0_2], %0 {strides = array<i32>} : memref<2x128xf32, #tpu.memory_space<vmem>>, vector<2x128xf32>,
    return
  }
  func.func @transform_0(%arg0: i32) -> (i32, i32) {
    %c0_i32 = arith.constant 0 : i32
    %c0_i32_0 = arith.constant 0 : i32
    return %arg0, %c0_i32 : i32, i32
  }
  func.func @transform_1(%arg0: i32) -> (i32, i32) {
    %c0_i32 = arith.constant 0 : i32
    %c0_i32_0 = arith.constant 0 : i32
    return %arg0, %c0_i32 : i32, i32
  }
}

</mosaic_0001>

<bundles_post_ra>
// kernel: tpu_custom_call.1
= control target key start
LH: loop header
LB: loop body
LE: loop exit
PB: predicated region body
PF: predicated region fallthrough
CT: control target
= control target key end

     0   :  { %6 = vsyncpa [#allocation3], 0  ;;  %s102_s0 = inlined_call_operand.hbm [shape: f32[2,128], index: 0, kind: input, shape index: {}]   ;;  %s103_s1 = inlined_call_operand.hbm [shape: f32[2,128], index: 1, kind: output, shape index: {}]  }
   0x1   :  { %7 = vsyncpa [#allocation4], 0  ;;  %s84_s6 = smov [#allocation2]  }
   0x2   :  { %s14_s7 = sshll.u32 %s84_s6, 4  ;;  %s15_s7 = int_to_ptr.vmem [resolvable:$true] %s14_s7 }
   0x3   :  { %s48_s8 = scalar_lea.vmem %s15_s7, 32  ;;  %p53_p1 = scmp.lt.s32.totalorder %s15_s7, %s15_s7 }
   0x4   :  { %p49_p0 = scmp.ne.s32.totalorder %s15_s7, %s48_s8  ;;  %p54_p2 = scmp.lt.s32.totalorder %s48_s8, %s48_s8 }
   0x6   :  { %p55_p3 = por %p54_p2, %p53_p1 }
   0x8   :  { %p56_p4 = pnand %p55_p3, %p49_p0 }
   0xa   :  { %59 = shalt.err (!%p56_p4)
}
   0xb   :  { %17 = dma.hbm_to_vmem [thread:$0]  %s102_s0, 32, %s15_s7, [#allocation3]  }
   0xc   :  { %80 = dma.done.wait [#allocation3], 32  }
   0xd   :  { %81 = vsyncadd [#allocation3], 4294967264  ;;  %s85_s11 = smov [#allocation5]   ;;  %v21_v0 = vld [vmem:[#allocation2] sm:$0x3] }
   0xe   :  { %s29_s12 = sshll.u32 %s85_s11, 4  ;;  %22 = vst [vmem:[#allocation5] sm:$0x3] %v21_v0  ;;  %s30_s12 = int_to_ptr.vmem [resolvable:$true] %s29_s12 }
   0xf   :  { %s60_s13 = scalar_lea.vmem %s30_s12, 32  ;;  %p65_p6 = scmp.lt.s32.totalorder %s30_s12, %s30_s12 }
  0x10   :  { %p61_p5 = scmp.ne.s32.totalorder %s30_s12, %s60_s13  ;;  %p66_p7 = scmp.lt.s32.totalorder %s60_s13, %s60_s13 }
  0x12   :  { %p67_p8 = por %p66_p7, %p65_p6 }
  0x14   :  { %p68_p9 = pnand %p67_p8, %p61_p5 }
  0x16   :  { %71 = shalt.err (!%p68_p9)
}
  0x17   :  { %32 = dma.vmem_to_hbm [thread:$0]  %s30_s12, 32, %s103_s1, [#allocation4]  }
  0x18   :  { %82 = dma.done.wait [#allocation4], 32  }
  0x19   :  { %83 = vsyncadd [#allocation4], 4294967264 }
  0x1a   :  { %36 = vsyncpa [#allocation3], 1 }
  0x1b   :  { %37 = vsyncpa [#allocation4], 1 }

</bundles_post_ra>
